<compile_context>
chip_gen: v7x
topology: tpu7x:2x2x1
jax: 0.10.0
libtpu: 0.0.40
codegen_flags: <defaults>
</compile_context>

<pallas_src>
import functools

import jax
import jax.numpy as jnp
from jax.experimental import pallas as pl
from jax.experimental.pallas import tpu as pltpu

_LANE = 128
_VMEM_TILE_BUDGET = 40 * 1024 * 1024   # conservative vs v7x's 64 MiB physical VMEM
_VMEM_LIMIT_CAP = 48 * 1024 * 1024


def _round_up(x, m):
    return (x + m - 1) // m * m


def _bnlinear_kernel(x_ref, w_ref, b_ref, o_ref):
    # x: (TM, Kp) f32/bf16, w: (Kp, TN) bf16, b: (1, TN) f32 -> o: (TM, TN)
    x = x_ref[...].astype(jnp.bfloat16)            # free VPU cast under the MXU
    acc = jnp.dot(x, w_ref[...], preferred_element_type=jnp.float32)
    o_ref[...] = (acc + b_ref[...]).astype(o_ref.dtype)


def fold_bn_linear_params(params, eps=1e-5):
    """One-time preprocessing: fold eval-mode BN1d into the Linear, pad + cast.

    Returns:
      wp : (Kp, Np) bf16  BN-folded weight, zero-padded to lane multiples
      bp : (1,  Np) f32   BN-folded bias,   zero-padded
    """
    gamma, beta = params["gamma"], params["beta"]
    mean, var = params["mean"], params["var"]
    W, b = params["weight"], params["bias"]            # (C, D), (C,)
    C, D = W.shape

    s = gamma * jax.lax.rsqrt(var + eps)                # (D,)
    t = beta - mean * s                                 # (D,)
    w_folded = (W * s[None, :]).T                       # (D, C)
    b_folded = t @ W.T + b                              # (C,)  kept in f32

    Kp = _round_up(D, _LANE)
    Np = _round_up(C, _LANE)
    wp = jnp.zeros((Kp, Np), jnp.bfloat16).at[:D, :C].set(w_folded.astype(jnp.bfloat16))
    bp = jnp.zeros((1, Np), jnp.float32).at[0, :C].set(b_folded.astype(jnp.float32))
    return wp, bp


def classblock_bnlinear_forward(x, wp, bp, class_num, out_dtype=jnp.float32):
    """Forward of ClassBlock_BNLinear (eval mode): Linear(BatchNorm1d(x)).

    `wp`, `bp` come from `fold_bn_linear_params` (computed once per parameter
    set).  `class_num` / `out_dtype` must be static when this is jitted.
    """
    M, D = x.shape
    Kp, Np = wp.shape
    C = int(class_num)

    # ---- x path: no pad / no extra HBM pass when input_dim is lane-aligned ----
    if D == Kp:
        x_in = x                                   # fed straight to the kernel
    else:
        # ragged input_dim: zero-pad K (needed to match the zero-padded weight rows)
        x_in = jnp.zeros((M, Kp), x.dtype).at[:, :D].set(x)

    x_bytes = jnp.dtype(x_in.dtype).itemsize
    o_bytes = jnp.dtype(out_dtype).itemsize

    # ---- N tile: 256 (full MXU width on v6e/v7x) only when it still leaves
    # >=2 N tiles; 128 otherwise (also the right choice for v5e's 128-wide MXU).
    TN = 256 if (Np % 256 == 0 and Np >= 512) else 128
    grid_n = Np // TN

    # ---- M tile: largest multiple of 16 (<= 512) covering M that fits the VMEM
    # budget.  If the N axis has only one tile, split M into >= 2 tiles so both
    # v7x TensorCores get work.
    def tile_vmem_bytes(tm, tn):
        # default double-buffering on every streamed operand/result
        return 2 * (tm * Kp * x_bytes + Kp * tn * 2 + tn * 4 + tm * tn * o_bytes)

    m16 = _round_up(M, 16)
    TM = 16
    for cand in (512, 256, 128, 64, 32, 16):
        if cand <= m16 and tile_vmem_bytes(cand, TN) <= _VMEM_TILE_BUDGET:
            TM = cand
            break
    if grid_n == 1 and M >= 32:
        TM = min(TM, _round_up(pl.cdiv(M, 2), 16))
    grid_m = pl.cdiv(M, TM)

    vmem_limit = min(_VMEM_LIMIT_CAP,
                     max(16 * 1024 * 1024,
                         int(1.5 * tile_vmem_bytes(TM, TN)) + (2 << 20)))

    cost = pl.CostEstimate(
        flops=2 * M * Kp * Np,
        transcendentals=0,
        bytes_accessed=M * Kp * x_bytes + Kp * Np * 2 + Np * 4 + M * C * o_bytes,
    )

    out = pl.pallas_call(
        _bnlinear_kernel,
        out_shape=jax.ShapeDtypeStruct((M, Np), out_dtype),
        grid=(grid_m, grid_n),
        in_specs=[
            pl.BlockSpec((TM, Kp), lambda i, j: (i, 0)),   # x tile (reused across N steps)
            pl.BlockSpec((Kp, TN), lambda i, j: (0, j)),   # folded bf16 weight, streamed over N
            pl.BlockSpec((1, TN), lambda i, j: (0, j)),    # folded f32 bias
        ],
        out_specs=pl.BlockSpec((TM, TN), lambda i, j: (i, j)),
        compiler_params=pltpu.CompilerParams(
            dimension_semantics=("parallel", "parallel"),  # shardable across v7x TCs
            vmem_limit_bytes=vmem_limit,
        ),
        cost_estimate=cost,
    )(x_in, wp, bp)

    # Lane-padded columns (zero weight + zero bias) are sliced off inside the
    # same jit; when class_num is a multiple of 128 this is a no-op.
    return out if Np == C else out[:, :C]


def make_classblock_bnlinear(params, eps=1e-5, out_dtype=jnp.float32):
    """Build a jitted forward; BN folding / padding / casting happens ONCE here."""
    wp, bp = fold_bn_linear_params(params, eps)            # one-time, eager
    C = int(params["weight"].shape[0])
    fwd = jax.jit(functools.partial(classblock_bnlinear_forward,
                                    class_num=C, out_dtype=out_dtype))
    return lambda x: fwd(x, wp, bp)


if __name__ == "__main__":
    # Small shapes consistent with the module: batch x input_dim -> class_num.
    B, D, C = 64, 256, 16
    EPS = 1e-5

    key = jax.random.PRNGKey(0)
    kx, kg, kb, km, kv, kw = jax.random.split(key, 6)

    x = jax.random.normal(kx, (B, D), jnp.float32)
    params = dict(
        # BatchNorm1d(input_dim) running stats / affine
        gamma=1.0 + 0.1 * jax.random.normal(kg, (D,), jnp.float32),
        beta=0.1 * jax.random.normal(kb, (D,), jnp.float32),
        mean=0.1 * jax.random.normal(km, (D,), jnp.float32),
        var=1.0 + 0.2 * jax.random.uniform(kv, (D,), jnp.float32),
        # Linear(input_dim, class_num) with weights_init_classifier:
        #   normal_(std=0.001) weight, zero bias
        weight=0.001 * jax.random.normal(kw, (C, D), jnp.float32),
        bias=jnp.zeros((C,), jnp.float32),
    )

    fwd = make_classblock_bnlinear(params, eps=EPS)
    y = fwd(x)
    jax.block_until_ready(y)
    assert y.shape == (B, C)

    # Pure-JAX reference (eval-mode BN1d + Linear); tolerance covers the bf16
    # MXU operands (accumulation is f32, bias fold is f32).
    xn = (x - params["mean"]) / jnp.sqrt(params["var"] + EPS) * params["gamma"] + params["beta"]
    ref = xn @ params["weight"].T + params["bias"]
    rel_err = jnp.linalg.norm(y - ref) / (jnp.linalg.norm(ref) + 1e-12)
    assert float(rel_err) < 2e-2, f"relative error too large: {float(rel_err)}"

    print("KERNEL_OK")
</pallas_src>

<mosaic_0001>
module attributes {stable_mosaic.version = 11 : i64} {
  func.func @_bnlinear_kernel(%arg0: i32, %arg1: i32, %arg2: memref<32x256xf32, #tpu.memory_space<vmem>>, %arg3: memref<256x128xbf16, #tpu.memory_space<vmem>>, %arg4: memref<1x128xf32, #tpu.memory_space<vmem>>, %arg5: memref<32x128xf32, #tpu.memory_space<vmem>>) attributes {dimension_semantics = [#tpu.dimension_semantics<parallel>, #tpu.dimension_semantics<parallel>], iteration_bounds = array<i64: 2, 1>, scalar_prefetch = 0 : i64, scratch_operands = 0 : i64, tpu.core_type = #tpu.core_type<tc>, window_params = [{transform_indices = @transform_0, window_bounds = array<i64: 32, 256>}, {transform_indices = @transform_1, window_bounds = array<i64: 256, 128>}, {transform_indices = @transform_2, window_bounds = array<i64: 1, 128>}, {transform_indices = @transform_3, window_bounds = array<i64: 32, 128>}]} {
    %c0 = arith.constant 0 : index
    %c0_0 = arith.constant 0 : index
    %0 = vector.load %arg2[%c0, %c0_0] : memref<32x256xf32, #tpu.memory_space<vmem>>, vector<32x256xf32>
    %1 = arith.truncf %0 : vector<32x256xf32> to vector<32x256xbf16>
    %c0_1 = arith.constant 0 : index
    %c0_2 = arith.constant 0 : index
    %2 = vector.load %arg3[%c0_1, %c0_2] : memref<256x128xbf16, #tpu.memory_space<vmem>>, vector<256x128xbf16>
    %cst = arith.constant dense<0.000000e+00> : vector<32x128xf32>
    %3 = tpu.matmul %1, %2, %cst {dimension_numbers = #tpu.dot_dimension_numbers<[1], [0], [0], [1], [0, 0, 1, 1], [], []>} : vector<32x256xbf16>, vector<256x128xbf16>, vector<32x128xf32> -> vector<32x128xf32>
    %c0_3 = arith.constant 0 : index
    %c0_4 = arith.constant 0 : index
    %4 = vector.load %arg4[%c0_3, %c0_4] : memref<1x128xf32, #tpu.memory_space<vmem>>, vector<1x128xf32>
    %5 = vector.broadcast %4 : vector<1x128xf32> to vector<32x128xf32>
    %6 = arith.addf %3, %5 : vector<32x128xf32>
    %c0_5 = arith.constant 0 : index
    %c0_6 = arith.constant 0 : index
    %7 = vector.load %arg5[%c0_5, %c0_6] : memref<32x128xf32, #tpu.memory_space<vmem>>, vector<32x128xf32>
    tpu.vector_store %arg5[%c0_5, %c0_6], %6 {strides = array<i32>} : memref<32x128xf32, #tpu.memory_space<vmem>>, vector<32x128xf32>,
    return
  }
  func.func @transform_0(%arg0: i32, %arg1: i32) -> (i32, i32) {
    %c0_i32 = arith.constant 0 : i32
    %c0_i32_0 = arith.constant 0 : i32
    return %arg0, %c0_i32 : i32, i32
  }
  func.func @transform_1(%arg0: i32, %arg1: i32) -> (i32, i32) {
    %c0_i32 = arith.constant 0 : i32
    %c0_i32_0 = arith.constant 0 : i32
    return %c0_i32, %arg1 : i32, i32
  }
  func.func @transform_2(%arg0: i32, %arg1: i32) -> (i32, i32) {
    %c0_i32 = arith.constant 0 : i32
    %c0_i32_0 = arith.constant 0 : i32
    return %c0_i32, %arg1 : i32, i32
  }
  func.func @transform_3(%arg0: i32, %arg1: i32) -> (i32, i32) {
    %c0_i32 = arith.constant 0 : i32
    return %arg0, %arg1 : i32, i32
  }
}

</mosaic_0001>

<bundles_post_ra>
// kernel: classblock_bnlinear_forward.1
= control target key start
LH: loop header
LB: loop body
LE: loop exit
PB: predicated region body
PF: predicated region fallthrough
CT: control target
= control target key end

     0   :  { %8 = vsyncpa [#allocation3], 0  ;;  %s1037_s0 = inlined_call_operand.hbm [shape: f32[64,256], index: 0, kind: input, shape index: {}]   ;;  %s1038_s1 = inlined_call_operand.hbm [shape: bf16[256,128], index: 1, kind: input, shape index: {}]   ;;  %s1039_s2 = inlined_call_operand.vmem [shape: f32[1,128], index: 2, kind: input, shape index: {}]   ;;  %s1040_s3 = inlined_call_operand.vmem [shape: f32[64,128], index: 3, kind: output, shape index: {}]  }
   0x1   :  { %10 = vsyncpa [#allocation3 + $0x1], 0 }
   0x2   :  { %11 = vsyncpa [#allocation5], 0  ;;  %s867_s12 = smov 0   ;;  %s869_s13 = smov 0  }
   0x3   :  { %s871_s14 = smov 0   ;;  %s873_s15 = smov 0  }
   0x4   :  { %s875_s16 = smov 0   ;;  %s877_s17 = smov 0  }
   0x5 LB: > { %s561_s18 = sadd.s32 4294967295, %s839_s17   ;;  %p49_p0 = scmp.ne.s32.totalorder %s823_s13, %s819_s12  ;;  %s839_s17 = sphi %s877_s17, %s17_s17   ;;  %s835_s16 = sphi %s875_s16, %s1057_s16   ;;  %s831_s15 = sphi %s873_s15, %s1056_s15   ;;  %s827_s14 = sphi %s871_s14, %s1055_s14   ;;  %s823_s13 = sphi %s869_s13, %s1054_s13   ;;  %s819_s12 = sphi %s867_s12, %s1053_s12  }
   0x6   : > { %p897_p1 = scmp.eq.s32.totalorder %s561_s18, 0  ;;  %p563_p2 = scmp.ge.s32.totalorder %s839_s17, 1 }
   0x7   : > { %p140_p3 = scmp.lt.s32.totalorder %s839_s17, 3  ;;  %s841_s22 = smov [#allocation4]  }
   0x8   : > { %s1045_s19 = scalar_select %p897_p1, 1, 0 }
   0x9   : > { %p905_p4 = por %p897_p1, %p49_p0  ;;  %p909_p5 = pnand %p563_p2, %p140_p3 }
   0xa   : > { %s154_s23 = sshll.u32 %s841_s22, 4  ;;  %s29_s25 = sadd.s32 1, %s835_s16  ;;  %s155_s23 = int_to_ptr.vmem [resolvable:$true] %s154_s23 }
   0xb   : > { %s1046_s20 = scalar_select %p905_p4, 1, 0 }
   0xc   : > { %s1047_s21 = scalar_select %p909_p5, 1, 0 }
   0xd   : > { %p647_p6 = pneg %p909_p5  ;;  %s727_s28 = scalar_lea.hbm %s1038_s1, 2048 }
   0xe   : > { %p728_p8 = scmp.ne.s32.totalorder %s1038_s1, %s727_s28  ;;  %p734_p12 = scmp.lt.u32.totalorder %s727_s28, %s1038_s1 }
   0xf   : > { %p917_p7 = pnand %p647_p6, %p897_p1 }
  0x11   : > { %p729_p9 = pneg %p917_p7 }
  0x13   : > { %p730_p10 = pnand %p729_p9, %p728_p8 }
  0x15   : > { %p731_p11 = pneg %p730_p10 }
  0x17   : > { %p736_p13 = pnand %p734_p12, %p731_p11 }
  0x19   : > { %739 = shalt.err (!%p736_p13)
}
  0x1a   : > { %s740_s6 = scalar_lea.vmem %s155_s23, 2048  ;;  %p748_p6 = scmp.lt.s32.totalorder %s155_s23, %s155_s23 }
  0x1b   : > { %p741_p0 = scmp.ne.s32.totalorder %s155_s23, %s740_s6  ;;  %p749_p1 = scmp.lt.s32.totalorder %s740_s6, %s740_s6 }
  0x1d   : > { %p743_p2 = pnand %p741_p0, %p729_p9  ;;  %p750_p4 = por %p749_p1, %p748_p6 }
  0x1f   : > { %p744_p3 = pneg %p743_p2 }
  0x21   : > { %p751_p5 = pnand %p750_p4, %p744_p3 }
  0x23   : > { %754 = shalt.err (!%p751_p5)
}
  0x24   : > { %s842_s7 = smov 64   ;;  %s843_s8 = smov 4  }
  0x25   : > { %650 = dma.hbm_to_vmem [thread:$0]  (!%p917_p7), %s1038_s1, 2048, %s155_s23, [#allocation5], %s842_s7, %s842_s7, %s843_s8  }
  0x26   : > { %p31_p1 = scmp.ge.s32.totalorder %s29_s25, 2  ;;  %s36_s11 = sadd.s32 1, %s827_s14 }
  0x27   : > { %p43_p4 = scmp.ne.s32.totalorder %s827_s14, %s823_s13  ;;  %p44_p5 = scmp.eq.s32.totalorder %s839_s17, 0 }
  0x28   : > { %s1059_s25 = smov (%p31_p1, %s29_s25), 0  ;;  %p656_p9 = scmp.lt.s32.totalorder %s839_s17, 2 }
  0x29   : > { %p45_p8 = por %p44_p5, %p43_p4  ;;  %s33_s12 = ssub.s32 %s835_s16, %s1059_s25 }
  0x2a   : > { %s174_s18 = sand.u32 1, %s827_s14   ;;  %p34_p10 = scmp.eq.s32.totalorder %s33_s12, 0 }
  0x2b   : > { %s567_s22 = sshll.u32 %s174_s18, 6  ;;  %s596_s26 = sshll.u32 %s835_s16, 10 }
  0x2c   : > { %s950_s27 = scalar_select %p34_p10, %s827_s14, %s36_s11  }
  0x2d   : > { %s955_s23 = scalar_lea.hbm %s1037_s0, %s596_s26  ;;  %s178_s29 = scalar_lea.vmem [#allocation2], %s567_s22 }
  0x2e   : > { %s186_s30 = sshll.u32 %s178_s29, 4  ;;  %p957_p7 = pnand %p656_p9, %p45_p8  ;;  %s961_s30 = int_to_ptr.vmem [resolvable:$true] %s186_s30 }
  0x2f   : > { %s963_s5 = scalar_lea.sflag [#allocation3], %s174_s18  ;;  %s755_s6 = scalar_lea.hbm %s955_s23, 1024 }
  0x30   : > { %p756_p11 = scmp.ne.s32.totalorder %s955_s23, %s755_s6  ;;  %p757_p12 = pneg %p957_p7 }
  0x31   : > { %s760_s9 = scalar_lea.hbm %s1037_s0, 2048  ;;  %p761_p2 = scmp.lt.u32.totalorder %s955_s23, %s1037_s0 }
  0x32   : > { %p758_p13 = pnand %p757_p12, %p756_p11  ;;  %p762_p3 = scmp.lt.u32.totalorder %s760_s9, %s755_s6 }
  0x33   : > { %p764_p1 = scmp.lt.u32.totalorder %s755_s6, %s955_s23 }
  0x34   : > { %p759_p0 = pneg %p758_p13  ;;  %p763_p6 = por %p762_p3, %p761_p2 }
  0x36   : > { %p765_p4 = por %p764_p1, %p763_p6 }
  0x38   : > { %p766_p5 = pnand %p765_p4, %p759_p0 }
  0x3a   : > { %769 = shalt.err (!%p766_p5)
}
  0x3b   : > { %s770_s12 = scalar_lea.vmem %s961_s30, 1024  ;;  %s844_s18 = smov [#allocation2]  }
  0x3c   : > { %p771_p8 = scmp.ne.s32.totalorder %s961_s30, %s770_s12  ;;  %s775_s22 = sshll.u32 %s844_s18, 4  ;;  %s776_s22 = int_to_ptr.vmem [resolvable:$false] %s775_s22 }
  0x3d   : > { %s777_s26 = scalar_lea.vmem %s776_s22, 2048  ;;  %p778_p11 = scmp.lt.s32.totalorder %s961_s30, %s776_s22 }
  0x3e   : > { %p773_p9 = pnand %p771_p8, %p757_p12  ;;  %p779_p13 = scmp.lt.s32.totalorder %s777_s26, %s770_s12 }
  0x40   : > { %p774_p10 = pneg %p773_p9  ;;  %p780_p2 = por %p779_p13, %p778_p11 }
  0x42   : > { %p781_p3 = pnand %p780_p2, %p774_p10 }
  0x44   : > { %784 = shalt.err (!%p781_p3)
}
  0x45   : > { %s845_s24 = smov 256   ;;  %s846_s28 = smov 16  }
  0x46   : > { %654 = dma.hbm_to_vmem [thread:$0]  (!%p957_p7), %s955_s23, 1024, %s961_s30, %s963_s5, %s845_s24, %s845_s24, %s846_s28  }
  0x47   : > { %p1050_p12 = scmp.ne.s32.totalorder %s1047_s21, 0 }
  0x48   : > { %s200_s29 = sand.u32 (!%p1050_p12), 1, %s823_s13   ;;  %p1051_p0 = scmp.ne.s32.totalorder (!%p1050_p12), %s1046_s20, 0 }
  0x49   : > { %198 = sbr.rel (%p1050_p12) target bundleno = 337 (0x151), region = 32  ;;  %s572_s6 = sshll.u32 (!%p1050_p12), %s200_s29, 6 }
  0x4a   : > { %s201_s7 = scalar_lea.sflag (!%p1050_p12), [#allocation3], %s200_s29  ;;  %s994_s8 = scalar_lea.vmem (!%p1050_p12), [#allocation2], %s572_s6 }
  0x50   : > { %810 = dma.done.wait (%p1051_p0), %s201_s7, 1024  }
  0x51   : > { %812 = vsyncadd (%p1051_p0), %s201_s7, 4294966272  ;;  %p1052_p6 = scmp.ne.s32.totalorder %s1045_s19, 0 }
  0x53   : > { %814 = dma.done.wait (%p1052_p6), [#allocation5], 2048  }
  0x54   : > { %816 = vsyncadd (%p1052_p6), [#allocation5], 4294965248  ;;  %v711_v0 = vld [vmem:[#allocation4 + $0x40] sm:$0xff]   ;;  %v713_v2 = vld [vmem:[#allocation4 + $0x48] sm:$0xff]   ;;  %s574_s19 = sshll.u32 %s831_s15, 2 }
  0x55   : > { %v712_v1 = vld [vmem:[#allocation4] sm:$0xff]   ;;  %597 = vmatprep.subr.bf16.mxu0 %v711_v0  ;;  %625 = vmatprep.subr.bf16.mxu1 %v711_v0  ;;  %v714_v3 = vld [vmem:[#allocation4 + $0x8] sm:$0xff]   ;;  %v715_v4 = vld [vmem:[#allocation4 + $0x50] sm:$0xff]   ;;  %p242_p7 = scmp.lt.s32.totalorder %s574_s19, 7 }
  0x56   : > { %598 = vmatpush3.bf16.msra.mxu0 %v712_v1  ;;  %633 = vmatpush3.bf16.msra.mxu1 %v712_v1  ;;  %v716_v5 = vld [vmem:[#allocation4 + $0x10] sm:$0xff]   ;;  %v717_v6 = vld [vmem:[#allocation4 + $0x58] sm:$0xff]   ;;  %v719_v8 = vld [vmem:[#allocation4 + $0x60] sm:$0xff]  }
  0x57   : > { %599 = vmatprep.subr.bf16.mxu0 %v713_v2  ;;  %626 = vmatprep.subr.bf16.mxu1 %v713_v2  ;;  %v718_v7 = vld [vmem:[#allocation4 + $0x18] sm:$0xff]   ;;  %v720_v9 = vld [vmem:[#allocation4 + $0x20] sm:$0xff]   ;;  %v721_v10 = vld [vmem:[#allocation4 + $0x68] sm:$0xff]   ;;  %s1061_s19 = smov (!%p242_p7, %s574_s19), 7 }
  0x58   : > { %v252_v11 = vld [vmem:[%s994_s8 + $0x8] sm:$0xff]  ;;  %v254_v12 = vld [vmem:[%s994_s8 + $0x18] sm:$0xff]  ;;  %v723_v18 = vld [vmem:[#allocation4 + $0x70] sm:$0xff]   ;;  %s575_s20 = sshll.u32 %s1061_s19, 3 }
  0x59   : > { %v256_v13 = vld [vmem:[%s994_s8 + $0x28] sm:$0xff]  ;;  %v260_v14 = vpack.c.bf16 %v254_v12, %v252_v11  ;;  %v258_v15 = vld [vmem:[%s994_s8 + $0x38] sm:$0xff]  ;;  %v724_v19 = vld [vmem:[#allocation4 + $0x30] sm:$0xff]   ;;  %s248_s5 = scalar_lea.vmem %s1040_s3, %s575_s20 }
  0x5a   : > { %600 = vmatpush3.bf16.msra.mxu0 %v714_v3  ;;  %634 = vmatpush3.bf16.msra.mxu1 %v714_v3  ;;  %v262_v16 = vpack.c.bf16 %v258_v15, %v256_v13  ;;  %v722_v17 = vld [vmem:[#allocation4 + $0x28] sm:$0xff]   ;;  %v725_v20 = vld [vmem:[#allocation4 + $0x78] sm:$0xff]   ;;  %v251_v22 = vld [vmem:[%s994_s8] sm:$0xff] }
  0x5b   : > { %601 = vmatprep.subr.bf16.mxu0 %v715_v4  ;;  %627 = vmatprep.subr.bf16.mxu1 %v715_v4  ;;  %v726_v21 = vld [vmem:[#allocation4 + $0x38] sm:$0xff]   ;;  %v253_v23 = vld [vmem:[%s994_s8 + $0x10] sm:$0xff]  ;;  %v255_v24 = vld [vmem:[%s994_s8 + $0x20] sm:$0xff] }
  0x5c   : > { %430 = vmatprep.mubr.bf16.mxu0 %v260_v14  ;;  %438 = vmatprep.mubr.bf16.mxu1 %v262_v16  ;;  %v257_v25 = vld [vmem:[%s994_s8 + $0x30] sm:$0xff]  ;;  %v259_v26 = vpack.c.bf16 %v253_v23, %v251_v22  ;;  %v576_v30 = vld [vmem:[%s1039_s2] ss:$0 sm:$0xff] }
  0x5d   : > { %v261_v27 = vpack.c.bf16 %v257_v25, %v255_v24 }
  0x5e   : > { %602 = vmatpush3.bf16.msra.mxu0 %v716_v5  ;;  %635 = vmatpush3.bf16.msra.mxu1 %v716_v5 }
  0x5f   : > { %603 = vmatprep.subr.bf16.mxu0 %v717_v6  ;;  %628 = vmatprep.subr.bf16.mxu1 %v717_v6 }
  0x62   : > { %604 = vmatpush3.bf16.msra.mxu0 %v718_v7  ;;  %636 = vmatpush3.bf16.msra.mxu1 %v718_v7 }
  0x63   : > { %605 = vmatprep.subr.bf16.mxu0 %v719_v8  ;;  %629 = vmatprep.subr.bf16.mxu1 %v719_v8 }
  0x66   : > { %606 = vmatpush3.bf16.msra.mxu0 %v720_v9  ;;  %637 = vmatpush3.bf16.msra.mxu1 %v720_v9 }
  0x67   : > { %607 = vmatprep.subr.bf16.mxu0 %v721_v10  ;;  %630 = vmatprep.subr.bf16.mxu1 %v721_v10 }
  0x6a   : > { %608 = vmatpush3.bf16.msra.mxu0 %v722_v17  ;;  %638 = vmatpush3.bf16.msra.mxu1 %v722_v17 }
  0x6b   : > { %609 = vmatprep.subr.bf16.mxu0 %v723_v18  ;;  %631 = vmatprep.subr.bf16.mxu1 %v723_v18 }
  0x6e   : > { %610 = vmatpush3.bf16.msra.mxu0 %v724_v19  ;;  %639 = vmatpush3.bf16.msra.mxu1 %v724_v19 }
  0x6f   : > { %611 = vmatprep.subr.bf16.mxu0 %v725_v20  ;;  %632 = vmatprep.subr.bf16.mxu1 %v725_v20 }
  0x72   : > { %612 = vmatpush3.bf16.msra.mxu0 %v726_v21  ;;  %640 = vmatpush3.bf16.msra.mxu1 %v726_v21 }
  0x75   : > { %431 = vmatmul.mubr.bf16.vlgmr.msra.gmra.mrb[0].mxu0 %v259_v26  ;;  %439 = vmatmul.mubr.bf16.vlgmr.msra.gmra.mrb[0].mxu1 %v261_v27 }
 0x148   : > { %v613_v28 = vpop.f32.mrb[0].mxu0  ;;  %v619_v29 = vpop.f32.mrb[0].mxu1 }
 0x149   : > { %v614_v31 = vpop.f32.mrb[1].mxu0  ;;  %v620_v32 = vpop.f32.mrb[1].mxu1 }
 0x14a   : > { %v615_v33 = vadd.f32 %v614_v31, %v613_v28  ;;  %v621_v34 = vadd.f32 %v620_v32, %v619_v29  ;;  %v616_v35 = vpop.f32.mrb[2].mxu0  ;;  %v622_v36 = vpop.f32.mrb[2].mxu1 }
 0x14b   : > { %v617_v37 = vpop.f32.mrb[3].mxu0  ;;  %v623_v38 = vpop.f32.mrb[3].mxu1 }
 0x14c   : > { %v433_v39 = vadd.f32 %v615_v33, %v576_v30  ;;  %v618_v40 = vadd.f32 %v617_v37, %v616_v35  ;;  %v624_v41 = vadd.f32 %v623_v38, %v622_v36  ;;  %v441_v43 = vadd.f32 %v621_v34, %v576_v30 }
 0x14e   : > { %447 = vst [vmem:[%s248_s5] sm:$0xff] %v433_v39  ;;  %v436_v42 = vadd.f32 %v618_v40, %v576_v30  ;;  %v444_v44 = vadd.f32 %v624_v41, %v576_v30  ;;  %449 = vst [vmem:[%s248_s5 + $0x10] sm:$0xff] %v441_v43 }
 0x150   : > { %448 = vst [vmem:[%s248_s5 + $0x8] sm:$0xff] %v436_v42  ;;  %450 = vst [vmem:[%s248_s5 + $0x18] sm:$0xff] %v444_v44 }
 0x151 PF: > { %s17_s17 = sadd.s32 1, %s839_s17   ;;  %s1053_s12 = smov %s823_s13 }
 0x152   : > { %p14_p1 = scmp.ge.s32.totalorder %s17_s17, 4   ;;  %s1054_s13 = smov %s827_s14 }
 0x153   : > { %s1055_s14 = smov %s950_s27  ;;  %s1056_s15 = smov %s835_s16 }
 0x154   : > { %s1057_s16 = smov %s1059_s25  ;;  %16 = sbr.rel (!%p14_p1) target bundleno = 5 (0x5), region = 80 }
 0x15b   :  { %479 = vsyncpa [#allocation3], 1 }
 0x15c   :  { %481 = vsyncpa [#allocation3 + $0x1], 1 }
 0x15d   :  { %482 = vsyncpa [#allocation5], 1 }

</bundles_post_ra>
